<compile_context>
chip_gen: v6e
topology: v6e:2x2x1
jax: 0.10.0
libtpu: 0.0.40
codegen_flags: <defaults>
</compile_context>

<pallas_src>
import functools

import jax
import jax.numpy as jnp
from jax.experimental import pallas as pl
from jax.experimental.pallas import tpu as pltpu


def _double_conv_kernel(x_ref, t1_ref, b1_ref, t2_ref, b2_ref, o_ref,
                        xpad_ref, apad_ref):
    """Fused conv3x3+ReLU -> conv3x3+ReLU for one image.

    x_ref : (1, H, W*Cin)        input tile (width/channel flattened, NHWC order)
    t1_ref: (3, W*Cin, W*C1)     per-kh block-Toeplitz weights, conv1
    b1_ref: (1, W*C1)            bias tiled across W, conv1
    t2_ref: (3, W*C1, W*C2)      per-kh block-Toeplitz weights, conv2
    b2_ref: (1, W*C2)            bias tiled across W, conv2
    o_ref : (1, H, W*C2)         output tile
    xpad_ref: VMEM (H+2, W*Cin)  height-padded input scratch
    apad_ref: VMEM (H+2, W*C1)   height-padded intermediate activation scratch
    """
    H = o_ref.shape[1]
    wcin = xpad_ref.shape[1]
    wc1 = apad_ref.shape[1]

    # ---- stage 0: input -> height-padded scratch (zero halo rows) ----
    xpad_ref[0:1, :] = jnp.zeros((1, wcin), jnp.float32)
    xpad_ref[H + 1:H + 2, :] = jnp.zeros((1, wcin), jnp.float32)
    xpad_ref[1:H + 1, :] = x_ref[0].astype(jnp.float32)

    # ---- conv1 + ReLU: three fat matmuls (K = W*Cin, N = W*C1, lane-dense) ----
    acc1 = jnp.dot(xpad_ref[0:H, :], t1_ref[0],
                   preferred_element_type=jnp.float32)
    acc1 += jnp.dot(xpad_ref[1:H + 1, :], t1_ref[1],
                    preferred_element_type=jnp.float32)
    acc1 += jnp.dot(xpad_ref[2:H + 2, :], t1_ref[2],
                    preferred_element_type=jnp.float32)
    acc1 = jnp.maximum(acc1 + b1_ref[...], 0.0)

    # ---- intermediate activation stays in VMEM (height-padded scratch) ----
    apad_ref[0:1, :] = jnp.zeros((1, wc1), jnp.float32)
    apad_ref[H + 1:H + 2, :] = jnp.zeros((1, wc1), jnp.float32)
    apad_ref[1:H + 1, :] = acc1

    # ---- conv2 + ReLU ----
    acc2 = jnp.dot(apad_ref[0:H, :], t2_ref[0],
                   preferred_element_type=jnp.float32)
    acc2 += jnp.dot(apad_ref[1:H + 1, :], t2_ref[1],
                    preferred_element_type=jnp.float32)
    acc2 += jnp.dot(apad_ref[2:H + 2, :], t2_ref[2],
                    preferred_element_type=jnp.float32)
    acc2 = jnp.maximum(acc2 + b2_ref[...], 0.0)

    o_ref[0] = acc2.astype(o_ref.dtype)


def conv3x3_to_row_toeplitz(w_hwio, width):
    """(3, 3, Cin, Cout) HWIO weights -> (3, W*Cin, W*Cout) per-kh Toeplitz.

    T[kh, w_in*Cin + c, w_out*Cout + o] = w[kh, w_in - w_out + 1, c, o]
    when 0 <= w_in - w_out + 1 <= 2, else 0 (this realizes the width
    zero-padding of padding=1).
    """
    _, _, cin, cout = w_hwio.shape
    w_in = jnp.arange(width)[:, None]
    w_out = jnp.arange(width)[None, :]
    kw = w_in - w_out + 1                                  # (W, W)
    valid = (kw >= 0) & (kw <= 2)
    kw_c = jnp.clip(kw, 0, 2)
    t = w_hwio[:, kw_c, :, :]                              # (3, W, W, Cin, Cout)
    t = jnp.where(valid[None, :, :, None, None], t, 0.0)
    t = jnp.transpose(t, (0, 1, 3, 2, 4))                  # (3, Win, Cin, Wout, Cout)
    return t.reshape(3, width * cin, width * cout)


def double_conv_pallas(x_nhwc, w1, b1, w2, b2):
    """Fused DoubleConv (conv->relu->conv->relu) via one pallas_call."""
    N, H, W, Cin = x_nhwc.shape
    C1 = w1.shape[-1]
    C2 = w2.shape[-1]

    x_flat = x_nhwc.reshape(N, H, W * Cin)
    t1 = conv3x3_to_row_toeplitz(w1, W)                    # (3, W*Cin, W*C1)
    t2 = conv3x3_to_row_toeplitz(w2, W)                    # (3, W*C1, W*C2)
    b1t = jnp.tile(b1, W).reshape(1, W * C1)
    b2t = jnp.tile(b2, W).reshape(1, W * C2)

    grid_spec = pltpu.PrefetchScalarGridSpec(
        num_scalar_prefetch=0,
        grid=(N,),
        in_specs=[
            pl.BlockSpec((1, H, W * Cin), lambda n: (n, 0, 0)),
            # Constant block index -> Pallas keeps the weights resident in VMEM
            # instead of re-fetching them each grid step.
            pl.BlockSpec((3, W * Cin, W * C1), lambda n: (0, 0, 0)),
            pl.BlockSpec((1, W * C1), lambda n: (0, 0)),
            pl.BlockSpec((3, W * C1, W * C2), lambda n: (0, 0, 0)),
            pl.BlockSpec((1, W * C2), lambda n: (0, 0)),
        ],
        out_specs=pl.BlockSpec((1, H, W * C2), lambda n: (n, 0, 0)),
        scratch_shapes=[
            pltpu.VMEM((H + 2, W * Cin), jnp.float32),   # height-padded input
            pltpu.VMEM((H + 2, W * C1), jnp.float32),    # intermediate activation
        ],
    )

    flops = N * 2 * H * 3 * ((W * Cin) * (W * C1) + (W * C1) * (W * C2))
    bytes_accessed = 4 * (x_flat.size + t1.size + t2.size
                          + b1t.size + b2t.size + N * H * W * C2)

    out_flat = pl.pallas_call(
        _double_conv_kernel,
        out_shape=jax.ShapeDtypeStruct((N, H, W * C2), x_nhwc.dtype),
        grid_spec=grid_spec,
        compiler_params=pltpu.CompilerParams(
            dimension_semantics=("parallel",),
        ),
        cost_estimate=pl.CostEstimate(
            flops=int(flops), transcendentals=0,
            bytes_accessed=int(bytes_accessed)),
    )(x_flat, t1, b1t, t2, b2t)

    return out_flat.reshape(N, H, W, C2)


def init_conv_params(key, in_channels, out_channels):
    """nn.Conv2d default init: uniform(-k, k), k = 1/sqrt(fan_in)."""
    kw_key, b_key = jax.random.split(key)
    fan_in = in_channels * 3 * 3
    k = 1.0 / jnp.sqrt(jnp.float32(fan_in))
    w_oihw = jax.random.uniform(
        kw_key, (out_channels, in_channels, 3, 3), jnp.float32, -k, k)
    w_hwio = jnp.transpose(w_oihw, (2, 3, 1, 0))
    bias = jax.random.uniform(b_key, (out_channels,), jnp.float32, -k, k)
    return w_hwio, bias


@functools.partial(jax.jit, static_argnames=())
def double_conv_forward(x_nchw, m, w1, b1, w2, b2):
    """DoubleConv.forward (netType='conv2d'): conv->relu->conv->relu, mask unchanged."""
    x = jnp.transpose(x_nchw, (0, 2, 3, 1))        # NCHW -> NHWC (lane-dense C last)
    y = double_conv_pallas(x, w1, b1, w2, b2)      # NHWC, fused kernel
    y = jnp.transpose(y, (0, 3, 1, 2))             # NHWC -> NCHW
    return y, m


def _reference(x_nchw, m, w1, b1, w2, b2):
    """Pure-JAX reference (lax conv) for correctness spot-check."""
    def conv(x, w_hwio, b):
        y = jax.lax.conv_general_dilated(
            x, w_hwio, window_strides=(1, 1), padding="SAME",
            dimension_numbers=("NCHW", "HWIO", "NCHW"))
        return jax.nn.relu(y + b.reshape(1, -1, 1, 1))
    x = conv(x_nchw, w1, b1)
    x = conv(x, w2, b2)
    return x, m


if __name__ == "__main__":
    key = jax.random.PRNGKey(0)
    k_x, k_m, k_c1, k_c2 = jax.random.split(key, 4)

    N, Cin, Cout, H, W = 2, 4, 8, 16, 16
    x = jax.random.normal(k_x, (N, Cin, H, W), jnp.float32)
    m = (jax.random.uniform(k_m, (N, Cin, H, W)) > 0.5).astype(jnp.float32)

    w1, b1 = init_conv_params(k_c1, Cin, Cout)   # conv1: in -> out
    w2, b2 = init_conv_params(k_c2, Cout, Cout)  # conv2: out -> out

    y, m_out = double_conv_forward(x, m, w1, b1, w2, b2)
    y = jax.block_until_ready(y)
    m_out = jax.block_until_ready(m_out)

    y_ref, m_ref = _reference(x, m, w1, b1, w2, b2)
    assert y.shape == (N, Cout, H, W)
    assert jnp.allclose(y, y_ref, atol=1e-4, rtol=1e-4)
    assert jnp.array_equal(m_out, m_ref)

    print("KERNEL_OK")
</pallas_src>

<mosaic_0001>
module attributes {stable_mosaic.version = 11 : i64} {
  func.func @_double_conv_kernel(%arg0: i32, %arg1: memref<1x16x64xf32, #tpu.memory_space<vmem>>, %arg2: memref<3x64x128xf32, #tpu.memory_space<vmem>>, %arg3: memref<1x128xf32, #tpu.memory_space<vmem>>, %arg4: memref<3x128x128xf32, #tpu.memory_space<vmem>>, %arg5: memref<1x128xf32, #tpu.memory_space<vmem>>, %arg6: memref<1x16x128xf32, #tpu.memory_space<vmem>>, %arg7: memref<18x64xf32, #tpu.memory_space<vmem>>, %arg8: memref<18x128xf32, #tpu.memory_space<vmem>>) attributes {dimension_semantics = [#tpu.dimension_semantics<parallel>], iteration_bounds = array<i64: 2>, scalar_prefetch = 0 : i64, scratch_operands = 2 : i64, tpu.core_type = #tpu.core_type<tc>, window_params = [{transform_indices = @transform_0, window_bounds = array<i64: 1, 16, 64>}, {pipeline_mode = #tpu.pipeline_mode<synchronous>, transform_indices = @transform_1, window_bounds = array<i64: 3, 64, 128>}, {pipeline_mode = #tpu.pipeline_mode<synchronous>, transform_indices = @transform_2, window_bounds = array<i64: 1, 128>}, {pipeline_mode = #tpu.pipeline_mode<synchronous>, transform_indices = @transform_3, window_bounds = array<i64: 3, 128, 128>}, {pipeline_mode = #tpu.pipeline_mode<synchronous>, transform_indices = @transform_4, window_bounds = array<i64: 1, 128>}, {transform_indices = @transform_5, window_bounds = array<i64: 1, 16, 128>}]} {
    %cst = arith.constant 0.000000e+00 : f32
    %0 = vector.broadcast %cst : f32 to vector<1x64xf32>
    %c0 = arith.constant 0 : index
    %c0_0 = arith.constant 0 : index
    %1 = vector.load %arg7[%c0, %c0_0] : memref<18x64xf32, #tpu.memory_space<vmem>>, vector<1x64xf32>
    tpu.vector_store %arg7[%c0, %c0_0], %0 {strides = array<i32>} : memref<18x64xf32, #tpu.memory_space<vmem>>, vector<1x64xf32>,
    %cst_1 = arith.constant 0.000000e+00 : f32
    %2 = vector.broadcast %cst_1 : f32 to vector<1x64xf32>
    %c17 = arith.constant 17 : index
    %c0_2 = arith.constant 0 : index
    %3 = vector.load %arg7[%c17, %c0_2] : memref<18x64xf32, #tpu.memory_space<vmem>>, vector<1x64xf32>
    tpu.vector_store %arg7[%c17, %c0_2], %2 {strides = array<i32>} : memref<18x64xf32, #tpu.memory_space<vmem>>, vector<1x64xf32>,
    %c0_3 = arith.constant 0 : index
    %c0_4 = arith.constant 0 : index
    %c0_5 = arith.constant 0 : index
    %4 = vector.load %arg1[%c0_3, %c0_4, %c0_5] : memref<1x16x64xf32, #tpu.memory_space<vmem>>, vector<1x16x64xf32>
    %5 = vector.shape_cast %4 : vector<1x16x64xf32> to vector<16x64xf32>
    %c1 = arith.constant 1 : index
    %c0_6 = arith.constant 0 : index
    %6 = vector.load %arg7[%c1, %c0_6] : memref<18x64xf32, #tpu.memory_space<vmem>>, vector<16x64xf32>
    tpu.vector_store %arg7[%c1, %c0_6], %5 {strides = array<i32>} : memref<18x64xf32, #tpu.memory_space<vmem>>, vector<16x64xf32>,
    %c0_7 = arith.constant 0 : index
    %c0_8 = arith.constant 0 : index
    %7 = vector.load %arg7[%c0_7, %c0_8] : memref<18x64xf32, #tpu.memory_space<vmem>>, vector<16x64xf32>
    %c0_9 = arith.constant 0 : index
    %c0_10 = arith.constant 0 : index
    %c0_11 = arith.constant 0 : index
    %8 = vector.load %arg2[%c0_9, %c0_10, %c0_11] : memref<3x64x128xf32, #tpu.memory_space<vmem>>, vector<1x64x128xf32>
    %9 = vector.shape_cast %8 : vector<1x64x128xf32> to vector<64x128xf32>
    %cst_12 = arith.constant dense<0.000000e+00> : vector<16x128xf32>
    %10 = tpu.matmul %7, %9, %cst_12 {dimension_numbers = #tpu.dot_dimension_numbers<[1], [0], [0], [1], [0, 0, 1, 1], [], []>} : vector<16x64xf32>, vector<64x128xf32>, vector<16x128xf32> -> vector<16x128xf32>
    %c1_13 = arith.constant 1 : index
    %c0_14 = arith.constant 0 : index
    %11 = vector.load %arg7[%c1_13, %c0_14] : memref<18x64xf32, #tpu.memory_space<vmem>>, vector<16x64xf32>
    %c1_15 = arith.constant 1 : index
    %c0_16 = arith.constant 0 : index
    %c0_17 = arith.constant 0 : index
    %12 = vector.load %arg2[%c1_15, %c0_16, %c0_17] : memref<3x64x128xf32, #tpu.memory_space<vmem>>, vector<1x64x128xf32>
    %13 = vector.shape_cast %12 : vector<1x64x128xf32> to vector<64x128xf32>
    %cst_18 = arith.constant dense<0.000000e+00> : vector<16x128xf32>
    %14 = tpu.matmul %11, %13, %cst_18 {dimension_numbers = #tpu.dot_dimension_numbers<[1], [0], [0], [1], [0, 0, 1, 1], [], []>} : vector<16x64xf32>, vector<64x128xf32>, vector<16x128xf32> -> vector<16x128xf32>
    %15 = arith.addf %10, %14 : vector<16x128xf32>
    %c2 = arith.constant 2 : index
    %c0_19 = arith.constant 0 : index
    %16 = vector.load %arg7[%c2, %c0_19] : memref<18x64xf32, #tpu.memory_space<vmem>>, vector<16x64xf32>
    %c2_20 = arith.constant 2 : index
    %c0_21 = arith.constant 0 : index
    %c0_22 = arith.constant 0 : index
    %17 = vector.load %arg2[%c2_20, %c0_21, %c0_22] : memref<3x64x128xf32, #tpu.memory_space<vmem>>, vector<1x64x128xf32>
    %18 = vector.shape_cast %17 : vector<1x64x128xf32> to vector<64x128xf32>
    %cst_23 = arith.constant dense<0.000000e+00> : vector<16x128xf32>
    %19 = tpu.matmul %16, %18, %cst_23 {dimension_numbers = #tpu.dot_dimension_numbers<[1], [0], [0], [1], [0, 0, 1, 1], [], []>} : vector<16x64xf32>, vector<64x128xf32>, vector<16x128xf32> -> vector<16x128xf32>
    %20 = arith.addf %15, %19 : vector<16x128xf32>
    %c0_24 = arith.constant 0 : index
    %c0_25 = arith.constant 0 : index
    %21 = vector.load %arg3[%c0_24, %c0_25] : memref<1x128xf32, #tpu.memory_space<vmem>>, vector<1x128xf32>
    %22 = vector.broadcast %21 : vector<1x128xf32> to vector<16x128xf32>
    %23 = arith.addf %20, %22 : vector<16x128xf32>
    %cst_26 = arith.constant 0.000000e+00 : f32
    %24 = vector.broadcast %cst_26 : f32 to vector<16x128xf32>
    %25 = arith.maximumf %23, %24 : vector<16x128xf32>
    %cst_27 = arith.constant 0.000000e+00 : f32
    %26 = vector.broadcast %cst_27 : f32 to vector<1x128xf32>
    %c0_28 = arith.constant 0 : index
    %c0_29 = arith.constant 0 : index
    %27 = vector.load %arg8[%c0_28, %c0_29] : memref<18x128xf32, #tpu.memory_space<vmem>>, vector<1x128xf32>
    tpu.vector_store %arg8[%c0_28, %c0_29], %26 {strides = array<i32>} : memref<18x128xf32, #tpu.memory_space<vmem>>, vector<1x128xf32>,
    %cst_30 = arith.constant 0.000000e+00 : f32
    %28 = vector.broadcast %cst_30 : f32 to vector<1x128xf32>
    %c17_31 = arith.constant 17 : index
    %c0_32 = arith.constant 0 : index
    %29 = vector.load %arg8[%c17_31, %c0_32] : memref<18x128xf32, #tpu.memory_space<vmem>>, vector<1x128xf32>
    tpu.vector_store %arg8[%c17_31, %c0_32], %28 {strides = array<i32>} : memref<18x128xf32, #tpu.memory_space<vmem>>, vector<1x128xf32>,
    %c1_33 = arith.constant 1 : index
    %c0_34 = arith.constant 0 : index
    %30 = vector.load %arg8[%c1_33, %c0_34] : memref<18x128xf32, #tpu.memory_space<vmem>>, vector<16x128xf32>
    tpu.vector_store %arg8[%c1_33, %c0_34], %25 {strides = array<i32>} : memref<18x128xf32, #tpu.memory_space<vmem>>, vector<16x128xf32>,
    %c0_35 = arith.constant 0 : index
    %c0_36 = arith.constant 0 : index
    %31 = vector.load %arg8[%c0_35, %c0_36] : memref<18x128xf32, #tpu.memory_space<vmem>>, vector<16x128xf32>
    %c0_37 = arith.constant 0 : index
    %c0_38 = arith.constant 0 : index
    %c0_39 = arith.constant 0 : index
    %32 = vector.load %arg4[%c0_37, %c0_38, %c0_39] : memref<3x128x128xf32, #tpu.memory_space<vmem>>, vector<1x128x128xf32>
    %33 = vector.shape_cast %32 : vector<1x128x128xf32> to vector<128x128xf32>
    %cst_40 = arith.constant dense<0.000000e+00> : vector<16x128xf32>
    %34 = tpu.matmul %31, %33, %cst_40 {dimension_numbers = #tpu.dot_dimension_numbers<[1], [0], [0], [1], [0, 0, 1, 1], [], []>} : vector<16x128xf32>, vector<128x128xf32>, vector<16x128xf32> -> vector<16x128xf32>
    %c1_41 = arith.constant 1 : index
    %c0_42 = arith.constant 0 : index
    %35 = vector.load %arg8[%c1_41, %c0_42] : memref<18x128xf32, #tpu.memory_space<vmem>>, vector<16x128xf32>
    %c1_43 = arith.constant 1 : index
    %c0_44 = arith.constant 0 : index
    %c0_45 = arith.constant 0 : index
    %36 = vector.load %arg4[%c1_43, %c0_44, %c0_45] : memref<3x128x128xf32, #tpu.memory_space<vmem>>, vector<1x128x128xf32>
    %37 = vector.shape_cast %36 : vector<1x128x128xf32> to vector<128x128xf32>
    %cst_46 = arith.constant dense<0.000000e+00> : vector<16x128xf32>
    %38 = tpu.matmul %35, %37, %cst_46 {dimension_numbers = #tpu.dot_dimension_numbers<[1], [0], [0], [1], [0, 0, 1, 1], [], []>} : vector<16x128xf32>, vector<128x128xf32>, vector<16x128xf32> -> vector<16x128xf32>
    %39 = arith.addf %34, %38 : vector<16x128xf32>
    %c2_47 = arith.constant 2 : index
    %c0_48 = arith.constant 0 : index
    %40 = vector.load %arg8[%c2_47, %c0_48] : memref<18x128xf32, #tpu.memory_space<vmem>>, vector<16x128xf32>
    %c2_49 = arith.constant 2 : index
    %c0_50 = arith.constant 0 : index
    %c0_51 = arith.constant 0 : index
    %41 = vector.load %arg4[%c2_49, %c0_50, %c0_51] : memref<3x128x128xf32, #tpu.memory_space<vmem>>, vector<1x128x128xf32>
    %42 = vector.shape_cast %41 : vector<1x128x128xf32> to vector<128x128xf32>
    %cst_52 = arith.constant dense<0.000000e+00> : vector<16x128xf32>
    %43 = tpu.matmul %40, %42, %cst_52 {dimension_numbers = #tpu.dot_dimension_numbers<[1], [0], [0], [1], [0, 0, 1, 1], [], []>} : vector<16x128xf32>, vector<128x128xf32>, vector<16x128xf32> -> vector<16x128xf32>
    %44 = arith.addf %39, %43 : vector<16x128xf32>
    %c0_53 = arith.constant 0 : index
    %c0_54 = arith.constant 0 : index
    %45 = vector.load %arg5[%c0_53, %c0_54] : memref<1x128xf32, #tpu.memory_space<vmem>>, vector<1x128xf32>
    %46 = vector.broadcast %45 : vector<1x128xf32> to vector<16x128xf32>
    %47 = arith.addf %44, %46 : vector<16x128xf32>
    %cst_55 = arith.constant 0.000000e+00 : f32
    %48 = vector.broadcast %cst_55 : f32 to vector<16x128xf32>
    %49 = arith.maximumf %47, %48 : vector<16x128xf32>
    %c0_56 = arith.constant 0 : index
    %c0_57 = arith.constant 0 : index
    %c0_58 = arith.constant 0 : index
    %50 = vector.load %arg6[%c0_56, %c0_57, %c0_58] : memref<1x16x128xf32, #tpu.memory_space<vmem>>, vector<1x16x128xf32>
    %51 = vector.shape_cast %50 : vector<1x16x128xf32> to vector<16x128xf32>
    %52 = vector.shape_cast %49 : vector<16x128xf32> to vector<1x16x128xf32>
    tpu.vector_store %arg6[%c0_56, %c0_57, %c0_58], %52 {strides = array<i32>} : memref<1x16x128xf32, #tpu.memory_space<vmem>>, vector<1x16x128xf32>,
    return
  }
  func.func @transform_0(%arg0: i32) -> (i32, i32, i32) {
    %c0_i32 = arith.constant 0 : i32
    %c0_i32_0 = arith.constant 0 : i32
    %c0_i32_1 = arith.constant 0 : i32
    return %arg0, %c0_i32, %c0_i32_0 : i32, i32, i32
  }
  func.func @transform_1(%arg0: i32) -> (i32, i32, i32) {
    %c0_i32 = arith.constant 0 : i32
    %c0_i32_0 = arith.constant 0 : i32
    %c0_i32_1 = arith.constant 0 : i32
    %c0_i32_2 = arith.constant 0 : i32
    return %c0_i32, %c0_i32_0, %c0_i32_1 : i32, i32, i32
  }
  func.func @transform_2(%arg0: i32) -> (i32, i32) {
    %c0_i32 = arith.constant 0 : i32
    %c0_i32_0 = arith.constant 0 : i32
    %c0_i32_1 = arith.constant 0 : i32
    return %c0_i32, %c0_i32_0 : i32, i32
  }
  func.func @transform_3(%arg0: i32) -> (i32, i32, i32) {
    %c0_i32 = arith.constant 0 : i32
    %c0_i32_0 = arith.constant 0 : i32
    %c0_i32_1 = arith.constant 0 : i32
    %c0_i32_2 = arith.constant 0 : i32
    return %c0_i32, %c0_i32_0, %c0_i32_1 : i32, i32, i32
  }
  func.func @transform_4(%arg0: i32) -> (i32, i32) {
    %c0_i32 = arith.constant 0 : i32
    %c0_i32_0 = arith.constant 0 : i32
    %c0_i32_1 = arith.constant 0 : i32
    return %c0_i32, %c0_i32_0 : i32, i32
  }
  func.func @transform_5(%arg0: i32) -> (i32, i32, i32) {
    %c0_i32 = arith.constant 0 : i32
    %c0_i32_0 = arith.constant 0 : i32
    %c0_i32_1 = arith.constant 0 : i32
    return %arg0, %c0_i32, %c0_i32_0 : i32, i32, i32
  }
}

</mosaic_0001>

<bundles_post_ra>
// kernel: tile.13
= control target key start
LH: loop header
LB: loop body
LE: loop exit
PB: predicated region body
PF: predicated region fallthrough
CT: control target
= control target key end

     0   :  { %s28_s0 = inlined_call_operand.vmem [shape: f32[8], index: 0, kind: input, shape index: {}]   ;;  %s29_s1 = inlined_call_operand.vmem [shape: f32[16,8], index: 1, kind: output, shape index: {}]  }
   0x1   :  { %v4_v0 = vld [vmem:[%s28_s0] ss:$0 sm:$0xff] }
   0x2   :  { %5 = vst [vmem:[%s29_s1] sm:$0xff] %v4_v0  ;;  %8 = vst [vmem:[%s29_s1 + $0x8] sm:$0xff] %v4_v0 }

// kernel: tile.14
= control target key start
LH: loop header
LB: loop body
LE: loop exit
PB: predicated region body
PF: predicated region fallthrough
CT: control target
= control target key end

     0   :  { %s133_s10 = smov 120   ;;  %s134_s11 = smov 104   ;;  %vm3_vm0 = vcmask 64512   ;;  %vm9_vm1 = vcmask 1048512   ;;  %vm15_vm2 = vcmask 982912   ;;  %vm21_vm3 = vcmask 917312   ;;  %s209_s0 = inlined_call_operand.vmem [shape: f32[16,8], index: 0, kind: input, shape index: {}]   ;;  %s210_s1 = inlined_call_operand.vmem [shape: f32[1,128], index: 1, kind: output, shape index: {}]  }
   0x1   :  { %v103_v0 = vld [vmem:[%s209_s0 + $0xf] sm:$0x1]   ;;  %v105_v1 = vld [vmem:[%s209_s0 + $0xd] sm:$0x1]   ;;  %v104_v2 = vld [vmem:[%s209_s0 + $0xe] sm:$0x1]  }
   0x2   :  { %7 = vrot.lane.b32.xlu0 %v103_v0, %s133_s10  ;;  %19 = vrot.lane.b32.xlu1 %v105_v1, %s134_s11  ;;  %v106_v3 = vld [vmem:[%s209_s0 + $0xc] sm:$0x1]   ;;  %s135_s16 = smov 112   ;;  %s136_s17 = smov 96   ;;  %v107_v4 = vld [vmem:[%s209_s0 + $0xb] sm:$0x1]  }
   0x3   :  { %v108_v5 = vld [vmem:[%s209_s0 + $0xa] sm:$0x1]   ;;  %v2_v6 = vld [vmem:[%s209_s0] sm:$0x1]   ;;  %s137_s24 = smov 88   ;;  %s138_s25 = smov 80  }
   0x4   :  { %4 = vst.msk [vmem:[#allocation0] sm:$0x1] %vm3_vm0, %v2_v6   ;;  %v109_v7 = vld [vmem:[%s209_s0 + $0x9] sm:$0x1]   ;;  %v110_v8 = vld [vmem:[%s209_s0 + $0x8] sm:$0x1]  }
   0x5   :  { %s139_s30 = smov 72   ;;  %s140_s2 = smov 64   ;;  %v111_v9 = vld [vmem:[%s209_s0 + $0x7] sm:$0x1]   ;;  %v112_v10 = vld [vmem:[%s209_s0 + $0x6] sm:$0x1]  }
   0x6   :  { %13 = vrot.lane.b32.xlu0 %v104_v2, %s135_s16  ;;  %25 = vrot.lane.b32.xlu1 %v106_v3, %s136_s17  ;;  %s141_s7 = smov 56   ;;  %s142_s8 = smov 48   ;;  %v113_v11 = vld [vmem:[%s209_s0 + $0x5] sm:$0x1]   ;;  %v114_v12 = vld [vmem:[%s209_s0 + $0x4] sm:$0x1]  }
   0x7   :  { %s143_s13 = smov 40   ;;  %s144_s14 = smov 32   ;;  %v115_v13 = vld [vmem:[%s209_s0 + $0x3] sm:$0x1]   ;;  %v116_v14 = vld [vmem:[%s209_s0 + $0x2] sm:$0x1]  }
   0x8   :  { %s145_s19 = smov 24   ;;  %s146_s20 = smov 16   ;;  %v117_v15 = vld [vmem:[%s209_s0 + $0x1] sm:$0x1]   ;;  %vm27_vm4 = vcmask 851712   ;;  %vm33_vm5 = vcmask 786112  }
   0x9   :  { %s147_s0 = smov 8   ;;  %vm39_vm6 = vcmask 720512   ;;  %vm45_vm7 = vcmask 654912   ;;  %vm51_vm8 = vcmask 589312   ;;  %vm57_vm9 = vcmask 523712  }
   0xa   :  { %31 = vrot.lane.b32.xlu0 %v107_v4, %s137_s24  ;;  %37 = vrot.lane.b32.xlu1 %v108_v5, %s138_s25  ;;  %vm63_vm10 = vcmask 458112   ;;  %vm69_vm11 = vcmask 392512   ;;  %vm75_vm12 = vcmask 326912   ;;  %vm81_vm13 = vcmask 261312  }
   0xb   :  { %vm87_vm14 = vcmask 195712   ;;  %vm93_vm15 = vcmask 130112  }
   0xe   :  { %43 = vrot.lane.b32.xlu0 %v109_v7, %s139_s30  ;;  %49 = vrot.lane.b32.xlu1 %v110_v8, %s140_s2 }
  0x12   :  { %55 = vrot.lane.b32.xlu0 %v111_v9, %s141_s7  ;;  %61 = vrot.lane.b32.xlu1 %v112_v10, %s142_s8 }
  0x16   :  { %67 = vrot.lane.b32.xlu0 %v113_v11, %s143_s13  ;;  %73 = vrot.lane.b32.xlu1 %v114_v12, %s144_s14 }
  0x1a   :  { %79 = vrot.lane.b32.xlu0 %v115_v13, %s145_s19  ;;  %85 = vrot.lane.b32.xlu1 %v116_v14, %s146_s20 }
  0x1e   :  { %91 = vrot.lane.b32.xlu0 %v117_v15, %s147_s0 }
  0x74   :  { %v8_v16 = vpop.permute.xlu0 %7   ;;  %v20_v17 = vpop.permute.xlu1 %19  }
  0x75   :  { %10 = vst.msk [vmem:[#allocation0] sm:$0x1] %vm9_vm1, %v8_v16  }
  0x78   :  { %v14_v18 = vpop.permute.xlu0 %13   ;;  %v26_v19 = vpop.permute.xlu1 %25  }
  0x79   :  { %16 = vst.msk [vmem:[#allocation0] sm:$0x1] %vm15_vm2, %v14_v18  }
  0x7a   :  { %22 = vst.msk [vmem:[#allocation0] sm:$0x1] %vm21_vm3, %v20_v17  }
  0x7b   :  { %28 = vst.msk [vmem:[#allocation0] sm:$0x1] %vm27_vm4, %v26_v19  }
  0x7c   :  { %v32_v20 = vpop.permute.xlu0 %31   ;;  %v38_v21 = vpop.permute.xlu1 %37  }
  0x7d   :  { %34 = vst.msk [vmem:[#allocation0] sm:$0x1] %vm33_vm5, %v32_v20  }
  0x7e   :  { %40 = vst.msk [vmem:[#allocation0] sm:$0x1] %vm39_vm6, %v38_v21  }
  0x80   :  { %v44_v22 = vpop.permute.xlu0 %43   ;;  %v50_v23 = vpop.permute.xlu1 %49  }
  0x81   :  { %46 = vst.msk [vmem:[#allocation0] sm:$0x1] %vm45_vm7, %v44_v22  }
  0x82   :  { %52 = vst.msk [vmem:[#allocation0] sm:$0x1] %vm51_vm8, %v50_v23  }
  0x84   :  { %v56_v24 = vpop.permute.xlu0 %55   ;;  %v62_v25 = vpop.permute.xlu1 %61  }
  0x85   :  { %58 = vst.msk [vmem:[#allocation0] sm:$0x1] %vm57_vm9, %v56_v24  }
  0x86   :  { %64 = vst.msk [vmem:[#allocation0] sm:$0x1] %vm63_vm10, %v62_v25  }
  0x88   :  { %v68_v26 = vpop.permute.xlu0 %67   ;;  %v74_v27 = vpop.permute.xlu1 %73  }
  0x89   :  { %70 = vst.msk [vmem:[#allocation0] sm:$0x1] %vm69_vm11, %v68_v26  }
  0x8a   :  { %76 = vst.msk [vmem:[#allocation0] sm:$0x1] %vm75_vm12, %v74_v27  }
  0x8c   :  { %v80_v28 = vpop.permute.xlu0 %79   ;;  %v86_v29 = vpop.permute.xlu1 %85  }
  0x8d   :  { %82 = vst.msk [vmem:[#allocation0] sm:$0x1] %vm81_vm13, %v80_v28  }
  0x8e   :  { %88 = vst.msk [vmem:[#allocation0] sm:$0x1] %vm87_vm14, %v86_v29  }
  0x90   :  { %v92_v30 = vpop.permute.xlu0 %91  }
  0x91   :  { %94 = vst.msk [vmem:[#allocation0] sm:$0x1] %vm93_vm15, %v92_v30  }
  0x98   :  { %v99_v31 = vld [vmem:[#allocation0] sm:$0x1] }
  0x99   :  { %102 = vst [vmem:[%s210_s1] sm:$0x1] %v99_v31 }

// kernel: double_conv_forward.1
= control target key start
LH: loop header
LB: loop body
LE: loop exit
PB: predicated region body
PF: predicated region fallthrough
CT: control target
= control target key end

     0   :  { %s1239_s18 = smov 0   ;;  %s1493_s0 = inlined_call_operand.vmem [shape: f32[2,16,64], index: 0, kind: input, shape index: {}]   ;;  %s1494_s1 = inlined_call_operand.vmem [shape: f32[3,64,128], index: 1, kind: input, shape index: {}]   ;;  %s1495_s2 = inlined_call_operand.vmem [shape: f32[1,128], index: 2, kind: input, shape index: {}]   ;;  %s1496_s3 = inlined_call_operand.vmem [shape: f32[3,128,128], index: 3, kind: input, shape index: {}]   ;;  %s1497_s4 = inlined_call_operand.vmem [shape: f32[1,128], index: 4, kind: input, shape index: {}]   ;;  %s1498_s5 = inlined_call_operand.vmem [shape: f32[2,16,128], index: 5, kind: output, shape index: {}]  }
   0x1 LB: > { %s876_s19 = sadd.s32 4294967295, %s1206_s18   ;;  %p880_p0 = scmp.ge.s32.totalorder %s1206_s18, 1  ;;  %s1206_s18 = sphi %s1239_s18, %s15_s18  }
   0x2   : > { %p187_p1 = scmp.lt.s32.totalorder %s1206_s18, 3 }
   0x4   : > { %p188_p2 = pnand %p880_p0, %p187_p1 }
   0x5   : > { %p215_p3 = scmp.lt.s32.totalorder (!%p188_p2), %s876_s19, 1 }
   0x6   : > { %191 = sbr.rel (%p188_p2) target bundleno = 483 (0x1e3), region = 40 }
   0xb   : > { %v892_v0 = vld [vmem:[%s1494_s1 + $0x78] sm:$0xff]  ;;  %v891_v2 = vld [vmem:[%s1494_s1 + $0x70] sm:$0xff]  ;;  %vm225_vm0 = vcmask 516096   ;;  %v890_v4 = vld [vmem:[%s1494_s1 + $0x68] sm:$0xff]  ;;  %s1500_s19 = smov (!%p215_p3, %s876_s19), 1  ;;  %v1208_v6 = vmov 0.0  }
   0xc   : > { %v242_v1 = vld [vmem:[%s1494_s1 + $0x38] sm:$0xff]  ;;  %1029 = vmatprep.subr.mxu0 %v892_v0  ;;  %v241_v3 = vld [vmem:[%s1494_s1 + $0x30] sm:$0xff]  ;;  %v240_v5 = vld [vmem:[%s1494_s1 + $0x28] sm:$0xff]  ;;  %226 = vst.msk [vmem:[#allocation2] sm:$0x1] %vm225_vm0, %v1208_v6  ;;  %s943_s11 = sshll.u32 %s1500_s19, 4 }
   0xd   : > { %1048 = vmatprep.subr.mxu1 %v242_v1  ;;  %1030 = vmatpush3.msra.mxu0 %v892_v0  ;;  %227 = vst.msk [vmem:[#allocation2 + $0x11] sm:$0x1] %vm225_vm0, %v1208_v6  ;;  %521 = vst [vmem:[#allocation3] sm:$0x1] %v1208_v6  ;;  %v889_v7 = vld [vmem:[%s1494_s1 + $0x60] sm:$0xff]  ;;  %vm230_vm1 = vcmask 523264   ;;  %s219_s16 = scalar_lea.vmem %s1493_s0, %s943_s11  ;;  %s224_s17 = scalar_lea.vmem %s1498_s5, %s943_s11 }
   0xe   : > { %1049 = vmatpush3.msra.mxu1 %v242_v1  ;;  %522 = vst [vmem:[#allocation3 + $0x11] sm:$0x1] %v1208_v6  ;;  %1031 = vmatprep.subr.mxu0 %v891_v2  ;;  %v239_v8 = vld [vmem:[%s1494_s1 + $0x20] sm:$0xff]  ;;  %v888_v9 = vld [vmem:[%s1494_s1 + $0x58] sm:$0xff]  ;;  %v229_v12 = vld [vmem:[%s219_s16 + $0x8] sm:$0xff] }
   0xf   : > { %1050 = vmatprep.subr.mxu1 %v241_v3  ;;  %1032 = vmatpush3.msra.mxu0 %v891_v2  ;;  %v238_v10 = vld [vmem:[%s1494_s1 + $0x18] sm:$0xff]  ;;  %v228_v11 = vld [vmem:[%s219_s16] sm:$0xff]  ;;  %232 = vst.msk [vmem:[#allocation2 + $0x9] sm:$0xff] %vm230_vm1, %v229_v12  ;;  %v887_v13 = vld [vmem:[%s1494_s1 + $0x50] sm:$0xff] }
  0x10   : > { %1051 = vmatpush3.msra.mxu1 %v241_v3  ;;  %1033 = vmatprep.subr.mxu0 %v890_v4  ;;  %231 = vst.msk [vmem:[#allocation2 + $0x1] sm:$0xff] %vm230_vm1, %v228_v11  ;;  %v237_v14 = vld [vmem:[%s1494_s1 + $0x10] sm:$0xff]  ;;  %v886_v15 = vld [vmem:[%s1494_s1 + $0x48] sm:$0xff]  ;;  %v885_v17 = vld [vmem:[%s1494_s1 + $0x40] sm:$0xff] }
  0x11   : > { %1052 = vmatprep.subr.mxu1 %v240_v5  ;;  %1034 = vmatpush3.msra.mxu0 %v890_v4  ;;  %v236_v16 = vld [vmem:[%s1494_s1 + $0x8] sm:$0xff]  ;;  %v235_v18 = vld [vmem:[%s1494_s1] sm:$0xff]  ;;  %v904_v23 = vld [vmem:[%s1494_s1 + $0xb8] sm:$0xff] }
  0x12   : > { %1053 = vmatpush3.msra.mxu1 %v240_v5  ;;  %1035 = vmatprep.subr.mxu0 %v889_v7  ;;  %v903_v25 = vld [vmem:[%s1494_s1 + $0xb0] sm:$0xff]  ;;  %v902_v26 = vld [vmem:[%s1494_s1 + $0xa8] sm:$0xff]  ;;  %v901_v27 = vld [vmem:[%s1494_s1 + $0xa0] sm:$0xff] }
  0x13   : > { %1054 = vmatprep.subr.mxu1 %v239_v8  ;;  %1036 = vmatpush3.msra.mxu0 %v889_v7  ;;  %v900_v28 = vld [vmem:[%s1494_s1 + $0x98] sm:$0xff]  ;;  %v899_v29 = vld [vmem:[%s1494_s1 + $0x90] sm:$0xff]  ;;  %v898_v30 = vld [vmem:[%s1494_s1 + $0x88] sm:$0xff] }
  0x14   : > { %1055 = vmatpush3.msra.mxu1 %v239_v8  ;;  %1037 = vmatprep.subr.mxu0 %v888_v9  ;;  %v897_v31 = vld [vmem:[%s1494_s1 + $0x80] sm:$0xff]  ;;  %v923_v33 = vld [vmem:[%s1496_s3 + $0xf8] sm:$0xff]  ;;  %v922_v34 = vld [vmem:[%s1496_s3 + $0xf0] sm:$0xff] }
  0x15   : > { %1056 = vmatprep.subr.mxu1 %v238_v10  ;;  %1038 = vmatpush3.msra.mxu0 %v888_v9  ;;  %v921_v35 = vld [vmem:[%s1496_s3 + $0xe8] sm:$0xff]  ;;  %v920_v36 = vld [vmem:[%s1496_s3 + $0xe0] sm:$0xff]  ;;  %v919_v37 = vld [vmem:[%s1496_s3 + $0xd8] sm:$0xff] }
  0x16   : > { %1057 = vmatpush3.msra.mxu1 %v238_v10  ;;  %1039 = vmatprep.subr.mxu0 %v887_v13  ;;  %v244_v21 = vld [vmem:[#allocation2 + $0x9] sm:$0xff]  ;;  %v542_v38 = vld [vmem:[%s1496_s3 + $0x78] sm:$0xff]  ;;  %v539_v43 = vld [vmem:[%s1496_s3 + $0x60] sm:$0xff] }
  0x17   : > { %1058 = vmatprep.subr.mxu1 %v237_v14  ;;  %1040 = vmatpush3.msra.mxu0 %v887_v13  ;;  %v243_v19 = vld [vmem:[#allocation2 + $0x1] sm:$0xff]  ;;  %v417_v32 = vld [vmem:[#allocation2 + $0xa] sm:$0xff]  ;;  %v538_v45 = vld [vmem:[%s1496_s3 + $0x58] sm:$0xff] }
  0x18   : > { %1059 = vmatpush3.msra.mxu1 %v237_v14  ;;  %1041 = vmatprep.subr.mxu0 %v886_v15  ;;  %v233_v20 = vld [vmem:[#allocation2] sm:$0xff]  ;;  %v234_v22 = vld [vmem:[#allocation2 + $0x8] sm:$0xff]  ;;  %v541_v39 = vld [vmem:[%s1496_s3 + $0x70] sm:$0xff] }
  0x19   : > { %1060 = vmatprep.subr.mxu1 %v236_v16  ;;  %1042 = vmatpush3.msra.mxu0 %v886_v15  ;;  %v416_v24 = vld [vmem:[#allocation2 + $0x2] sm:$0xff]  ;;  %v918_v41 = vld [vmem:[%s1496_s3 + $0xd0] sm:$0xff]  ;;  %v915_v46 = vld [vmem:[%s1496_s3 + $0xb8] sm:$0xff] }
  0x1a   : > { %1061 = vmatpush3.msra.mxu1 %v236_v16  ;;  %1043 = vmatprep.subr.mxu0 %v885_v17  ;;  %v540_v40 = vld [vmem:[%s1496_s3 + $0x68] sm:$0xff]  ;;  %v916_v44 = vld [vmem:[%s1496_s3 + $0xc0] sm:$0xff]  ;;  %v537_v47 = vld [vmem:[%s1496_s3 + $0x50] sm:$0xff] }
  0x1b   : > { %1062 = vmatprep.subr.mxu1 %v235_v18  ;;  %1044 = vmatpush3.msra.mxu0 %v885_v17  ;;  %v917_v42 = vld [vmem:[%s1496_s3 + $0xc8] sm:$0xff]  ;;  %v914_v48 = vld [vmem:[%s1496_s3 + $0xb0] sm:$0xff]  ;;  %v912_v51 = vld [vmem:[%s1496_s3 + $0xa0] sm:$0xff] }
  0x1c   : > { %1045 = vmatprep.mubr.msk.f32.mxu0 %vm230_vm1, %v243_v19  ;;  %1063 = vmatpush3.msra.mxu1 %v235_v18  ;;  %v536_v49 = vld [vmem:[%s1496_s3 + $0x48] sm:$0xff]  ;;  %v535_v52 = vld [vmem:[%s1496_s3 + $0x40] sm:$0xff]  ;;  %v911_v53 = vld [vmem:[%s1496_s3 + $0x98] sm:$0xff] }
  0x1d   : > { %1064 = vmatprep.mubr.msk.f32.mxu1 %vm230_vm1, %v233_v20  ;;  %1046 = vmatmul.mubr.msk.f32.vlgmr.msra.gmra.mxu0 %vm230_vm1, %v244_v21  ;;  %v913_v50 = vld [vmem:[%s1496_s3 + $0xa8] sm:$0xff]  ;;  %v534_v54 = vld [vmem:[%s1496_s3 + $0x38] sm:$0xff]  ;;  %v910_v55 = vld [vmem:[%s1496_s3 + $0x90] sm:$0xff] }
  0x1e   : > { %1065 = vmatmul.mubr.msk.f32.vlgmr.msra.gmra.mxu1 %vm230_vm1, %v234_v22  ;;  %1067 = vmatprep.subr.mxu0 %v904_v23  ;;  %v533_v56 = vld [vmem:[%s1496_s3 + $0x30] sm:$0xff]  ;;  %v909_v57 = vld [vmem:[%s1496_s3 + $0x88] sm:$0xff]  ;;  %v908_v59 = vld [vmem:[%s1496_s3 + $0x80] sm:$0xff] }
  0x1f   : > { %1083 = vmatprep.mubr.msk.f32.mxu0 %vm230_vm1, %v416_v24  ;;  %1068 = vmatpush3.msra.mxu0 %v904_v23  ;;  %v532_v58 = vld [vmem:[%s1496_s3 + $0x28] sm:$0xff]  ;;  %v531_v60 = vld [vmem:[%s1496_s3 + $0x20] sm:$0xff]  ;;  %v939_v61 = vld [vmem:[%s1496_s3 + $0x178] sm:$0xff] }
  0x20   : > { %1069 = vmatprep.subr.mxu0 %v903_v25  ;;  %1086 = vmatprep.subr.mxu1 %v923_v33  ;;  %v530_v62 = vld [vmem:[%s1496_s3 + $0x18] sm:$0xff]  ;;  %v529_v63 = vld [vmem:[%s1496_s3 + $0x10] sm:$0xff]  ;;  %v528_v0 = vld [vmem:[%s1496_s3 + $0x8] sm:$0xff] }
  0x21   : > { %1070 = vmatpush3.msra.mxu0 %v903_v25  ;;  %1087 = vmatpush3.msra.mxu1 %v923_v33  ;;  %v527_v1 = vld [vmem:[%s1496_s3] sm:$0xff]  ;;  %v938_v17 = vld [vmem:[%s1496_s3 + $0x170] sm:$0xff]  ;;  %v937_v18 = vld [vmem:[%s1496_s3 + $0x168] sm:$0xff] }
  0x22   : > { %1071 = vmatprep.subr.mxu0 %v902_v26  ;;  %1088 = vmatprep.subr.mxu1 %v922_v34  ;;  %v907_v8 = vld [vmem:[%s1495_s2] ss:$0 sm:$0xff]  ;;  %v935_v20 = vld [vmem:[%s1496_s3 + $0x158] sm:$0xff]  ;;  %v934_v24 = vld [vmem:[%s1496_s3 + $0x150] sm:$0xff] }
  0x23   : > { %1072 = vmatpush3.msra.mxu0 %v902_v26  ;;  %1089 = vmatpush3.msra.mxu1 %v922_v34  ;;  %v936_v19 = vld [vmem:[%s1496_s3 + $0x160] sm:$0xff]  ;;  %v933_v25 = vld [vmem:[%s1496_s3 + $0x148] sm:$0xff] }
  0x24   : > { %1073 = vmatprep.subr.mxu0 %v901_v27  ;;  %1090 = vmatprep.subr.mxu1 %v921_v35  ;;  %v932_v26 = vld [vmem:[%s1496_s3 + $0x140] sm:$0xff]  ;;  %v925_v33 = vld [vmem:[%s1496_s3 + $0x108] sm:$0xff] }
  0x25   : > { %1074 = vmatpush3.msra.mxu0 %v901_v27  ;;  %1091 = vmatpush3.msra.mxu1 %v921_v35  ;;  %v931_v27 = vld [vmem:[%s1496_s3 + $0x138] sm:$0xff]  ;;  %v924_v34 = vld [vmem:[%s1496_s3 + $0x100] sm:$0xff] }
  0x26   : > { %1075 = vmatprep.subr.mxu0 %v900_v28  ;;  %1092 = vmatprep.subr.mxu1 %v920_v36 }
  0x27   : > { %1076 = vmatpush3.msra.mxu0 %v900_v28  ;;  %1093 = vmatpush3.msra.mxu1 %v920_v36  ;;  %v930_v28 = vld [vmem:[%s1496_s3 + $0x130] sm:$0xff] }
  0x28   : > { %1077 = vmatprep.subr.mxu0 %v899_v29  ;;  %1094 = vmatprep.subr.mxu1 %v919_v37 }
  0x29   : > { %1078 = vmatpush3.msra.mxu0 %v899_v29  ;;  %1095 = vmatpush3.msra.mxu1 %v919_v37  ;;  %v929_v29 = vld [vmem:[%s1496_s3 + $0x128] sm:$0xff] }
  0x2a   : > { %1079 = vmatprep.subr.mxu0 %v898_v30  ;;  %1096 = vmatprep.subr.mxu1 %v918_v41 }
  0x2b   : > { %1080 = vmatpush3.msra.mxu0 %v898_v30  ;;  %1097 = vmatpush3.msra.mxu1 %v918_v41  ;;  %v928_v30 = vld [vmem:[%s1496_s3 + $0x120] sm:$0xff] }
  0x2c   : > { %1081 = vmatprep.subr.mxu0 %v897_v31  ;;  %1098 = vmatprep.subr.mxu1 %v917_v42 }
  0x2d   : > { %1082 = vmatpush3.msra.mxu0 %v897_v31  ;;  %1099 = vmatpush3.msra.mxu1 %v917_v42  ;;  %v927_v31 = vld [vmem:[%s1496_s3 + $0x118] sm:$0xff]  ;;  %v940_v42 = vld [vmem:[%s1497_s4] ss:$0 sm:$0xff] }
  0x2e   : > { %1084 = vmatmul.mubr.msk.f32.vlgmr.msra.gmra.mxu0 %vm230_vm1, %v417_v32  ;;  %1121 = vmatprep.subr.mxu0 %v542_v38  ;;  %v926_v32 = vld [vmem:[%s1496_s3 + $0x110] sm:$0xff] }
  0x2f   : > { %1122 = vmatpush3.msra.mxu0 %v542_v38  ;;  %1100 = vmatprep.subr.mxu1 %v916_v44 }
  0x30   : > { %1123 = vmatprep.subr.mxu0 %v541_v39  ;;  %1101 = vmatpush3.msra.mxu1 %v916_v44 }
  0x31   : > { %1124 = vmatpush3.msra.mxu0 %v541_v39  ;;  %1102 = vmatprep.subr.mxu1 %v915_v46 }
  0x32   : > { %1125 = vmatprep.subr.mxu0 %v540_v40  ;;  %1103 = vmatpush3.msra.mxu1 %v915_v46 }
  0x33   : > { %1126 = vmatpush3.msra.mxu0 %v540_v40  ;;  %1104 = vmatprep.subr.mxu1 %v914_v48 }
  0x34   : > { %1127 = vmatprep.subr.mxu0 %v539_v43  ;;  %1105 = vmatpush3.msra.mxu1 %v914_v48 }
  0x35   : > { %1128 = vmatpush3.msra.mxu0 %v539_v43  ;;  %1106 = vmatprep.subr.mxu1 %v913_v50 }
  0x36   : > { %1129 = vmatprep.subr.mxu0 %v538_v45  ;;  %1107 = vmatpush3.msra.mxu1 %v913_v50 }
  0x37   : > { %1130 = vmatpush3.msra.mxu0 %v538_v45  ;;  %1108 = vmatprep.subr.mxu1 %v912_v51 }
  0x38   : > { %1131 = vmatprep.subr.mxu0 %v537_v47  ;;  %1109 = vmatpush3.msra.mxu1 %v912_v51 }
  0x39   : > { %1132 = vmatpush3.msra.mxu0 %v537_v47  ;;  %1110 = vmatprep.subr.mxu1 %v911_v53 }
  0x3a   : > { %1133 = vmatprep.subr.mxu0 %v536_v49  ;;  %1111 = vmatpush3.msra.mxu1 %v911_v53 }
  0x3b   : > { %1134 = vmatpush3.msra.mxu0 %v536_v49  ;;  %1112 = vmatprep.subr.mxu1 %v910_v55 }
  0x3c   : > { %1135 = vmatprep.subr.mxu0 %v535_v52  ;;  %1113 = vmatpush3.msra.mxu1 %v910_v55 }
  0x3d   : > { %1136 = vmatpush3.msra.mxu0 %v535_v52  ;;  %1114 = vmatprep.subr.mxu1 %v909_v57 }
  0x3e   : > { %1137 = vmatprep.subr.mxu0 %v534_v54  ;;  %1115 = vmatpush3.msra.mxu1 %v909_v57 }
  0x3f   : > { %1138 = vmatpush3.msra.mxu0 %v534_v54  ;;  %1116 = vmatprep.subr.mxu1 %v908_v59 }
  0x40   : > { %1139 = vmatprep.subr.mxu0 %v533_v56  ;;  %1117 = vmatpush3.msra.mxu1 %v908_v59 }
  0x41   : > { %1140 = vmatpush3.msra.mxu0 %v533_v56  ;;  %1156 = vmatprep.subr.mxu1 %v939_v61 }
  0x42   : > { %1141 = vmatprep.subr.mxu0 %v532_v58 }
  0x43   : > { %1142 = vmatpush3.msra.mxu0 %v532_v58 }
  0x44   : > { %1143 = vmatprep.subr.mxu0 %v531_v60 }
  0x45   : > { %1144 = vmatpush3.msra.mxu0 %v531_v60 }
  0x46   : > { %1145 = vmatprep.subr.mxu0 %v530_v62 }
  0x47   : > { %1146 = vmatpush3.msra.mxu0 %v530_v62 }
  0x48   : > { %1147 = vmatprep.subr.mxu0 %v529_v63 }
  0x49   : > { %1148 = vmatpush3.msra.mxu0 %v529_v63 }
  0x4a   : > { %1149 = vmatprep.subr.mxu0 %v528_v0 }
  0x4b   : > { %1150 = vmatpush3.msra.mxu0 %v528_v0 }
  0x4c   : > { %1151 = vmatprep.subr.mxu0 %v527_v1 }
  0x4d   : > { %1152 = vmatpush3.msra.mxu0 %v527_v1 }
  0xdd   : > { %v1047_v2 = vpop.f32.mrf.mxu0 }
  0xde   : > { %v1066_v3 = vpop.f32.mrf.mxu1 }
  0xdf   : > { %v326_v4 = vpop.f32.mrf.mxu0  ;;  %v413_v6 = vadd.f32 %v1066_v3, %v1047_v2 }
  0xe0   : > { %v407_v5 = vpop.f32.mrf.mxu1 }
  0xe1   : > { %v408_v9 = vadd.f32 %v407_v5, %v326_v4 }
  0xee   : > { %v1085_v7 = vpop.f32.mrf.mxu0 }
  0xef   : > { %v509_v10 = vadd.f32 %v1085_v7, %v413_v6 }
  0xf0   : > { %v499_v11 = vpop.f32.mrf.mxu0 }
  0xf1   : > { %v518_v12 = vadd.f32 %v907_v8, %v509_v10  ;;  %v508_v13 = vadd.f32 %v499_v11, %v408_v9 }
  0xf3   : > { %v520_v14 = vmax.f32 %v518_v12, 0.0  ;;  %v517_v15 = vadd.f32 %v907_v8, %v508_v13 }
  0xf5   : > { %524 = vst [vmem:[#allocation3 + $0x9] sm:$0xff] %v520_v14  ;;  %v519_v16 = vmax.f32 %v517_v15, 0.0 }
  0xf7   : > { %523 = vst [vmem:[#allocation3 + $0x1] sm:$0xff] %v519_v16  ;;  %1118 = vmatprep.mubr.f32.mxu1 %v519_v16 }
  0xf8   : > { %1119 = vmatmul.mubr.f32.vlgmr.msra.gmra.mxu1 %v520_v14 }
  0xf9   : > { %1157 = vmatpush3.msra.mxu1 %v939_v61 }
  0xfa   : > { %1158 = vmatprep.subr.mxu1 %v938_v17 }
  0xfb   : > { %1159 = vmatpush3.msra.mxu1 %v938_v17 }
  0xfc   : > { %1160 = vmatprep.subr.mxu1 %v937_v18  ;;  %v713_v35 = vld [vmem:[#allocation3 + $0xa] sm:$0xff] }
  0xfd   : > { %1161 = vmatpush3.msra.mxu1 %v937_v18 }
  0xfe   : > { %v525_v21 = vld [vmem:[#allocation3] sm:$0xff]  ;;  %v526_v22 = vld [vmem:[#allocation3 + $0x8] sm:$0xff]  ;;  %1162 = vmatprep.subr.mxu1 %v936_v19 }
  0xff   : > { %v712_v23 = vld [vmem:[#allocation3 + $0x2] sm:$0xff]  ;;  %1153 = vmatprep.mubr.f32.mxu0 %v525_v21  ;;  %1163 = vmatpush3.msra.mxu1 %v936_v19 }
 0x100   : > { %1188 = vmatprep.mubr.f32.mxu1 %v712_v23  ;;  %1154 = vmatmul.mubr.f32.vlgmr.msra.gmra.mxu0 %v526_v22 }
 0x101   : > { %1164 = vmatprep.subr.mxu1 %v935_v20 }
 0x102   : > { %1165 = vmatpush3.msra.mxu1 %v935_v20 }
 0x103   : > { %1166 = vmatprep.subr.mxu1 %v934_v24 }
 0x104   : > { %1167 = vmatpush3.msra.mxu1 %v934_v24 }
 0x105   : > { %1168 = vmatprep.subr.mxu1 %v933_v25 }
 0x106   : > { %1169 = vmatpush3.msra.mxu1 %v933_v25 }
 0x107   : > { %1170 = vmatprep.subr.mxu1 %v932_v26 }
 0x108   : > { %1171 = vmatpush3.msra.mxu1 %v932_v26 }
 0x109   : > { %1172 = vmatprep.subr.mxu1 %v931_v27 }
 0x10a   : > { %1173 = vmatpush3.msra.mxu1 %v931_v27 }
 0x10b   : > { %1174 = vmatprep.subr.mxu1 %v930_v28 }
 0x10c   : > { %1175 = vmatpush3.msra.mxu1 %v930_v28 }
 0x10d   : > { %1176 = vmatprep.subr.mxu1 %v929_v29 }
 0x10e   : > { %1177 = vmatpush3.msra.mxu1 %v929_v29 }
 0x10f   : > { %1178 = vmatprep.subr.mxu1 %v928_v30 }
 0x110   : > { %1179 = vmatpush3.msra.mxu1 %v928_v30 }
 0x111   : > { %1180 = vmatprep.subr.mxu1 %v927_v31 }
 0x112   : > { %1181 = vmatpush3.msra.mxu1 %v927_v31 }
 0x113   : > { %1182 = vmatprep.subr.mxu1 %v926_v32 }
 0x114   : > { %1183 = vmatpush3.msra.mxu1 %v926_v32 }
 0x115   : > { %1184 = vmatprep.subr.mxu1 %v925_v33 }
 0x116   : > { %1185 = vmatpush3.msra.mxu1 %v925_v33 }
 0x117   : > { %1186 = vmatprep.subr.mxu1 %v924_v34 }
 0x118   : > { %1187 = vmatpush3.msra.mxu1 %v924_v34 }
 0x119   : > { %1189 = vmatmul.mubr.f32.vlgmr.msra.gmra.mxu1 %v713_v35 }
 0x1b8   : > { %v1120_v36 = vpop.f32.mrf.mxu1 }
 0x1ba   : > { %v628_v38 = vpop.f32.mrf.mxu1 }
 0x1c0   : > { %v1155_v37 = vpop.f32.mrf.mxu0 }
 0x1c1   : > { %v709_v40 = vadd.f32 %v1155_v37, %v1120_v36 }
 0x1c2   : > { %v703_v39 = vpop.f32.mrf.mxu0 }
 0x1c3   : > { %v704_v43 = vadd.f32 %v703_v39, %v628_v38 }
 0x1d9   : > { %v1190_v41 = vpop.f32.mrf.mxu1 }
 0x1da   : > { %v807_v44 = vadd.f32 %v1190_v41, %v709_v40 }
 0x1db   : > { %v797_v45 = vpop.f32.mrf.mxu1 }
 0x1dc   : > { %v816_v46 = vadd.f32 %v940_v42, %v807_v44  ;;  %v806_v47 = vadd.f32 %v797_v45, %v704_v43 }
 0x1de   : > { %v818_v48 = vmax.f32 %v816_v46, 0.0  ;;  %v815_v49 = vadd.f32 %v940_v42, %v806_v47 }
 0x1e0   : > { %820 = vst [vmem:[%s224_s17 + $0x8] sm:$0xff] %v818_v48  ;;  %v817_v50 = vmax.f32 %v815_v49, 0.0 }
 0x1e2   : > { %819 = vst [vmem:[%s224_s17] sm:$0xff] %v817_v50 }
 0x1e3 PF: > { %s15_s18 = sadd.s32 1, %s1206_s18  }
 0x1e4   : > { %p12_p4 = scmp.ge.s32.totalorder %s15_s18, 4  }
 0x1e6   :  { %14 = sbr.rel (!%p12_p4) target bundleno = 1 (0x1), region = 74 }

</bundles_post_ra>
